<compile_context>
chip_gen: v5e
topology: v5e:2x2
jax: 0.10.0
libtpu: 0.0.40
codegen_flags: <defaults>
</compile_context>

<pallas_src>
import numpy as np
import jax
import jax.numpy as jnp
from jax import lax
from jax.experimental import pallas as pl
from jax.experimental.pallas import tpu as pltpu


# ---------------------------------------------------------------------------
# host-side helpers
# ---------------------------------------------------------------------------

def _upsample_matrix(n_in: int) -> np.ndarray:
    """(2*n_in, n_in) bilinear interpolation matrix, align_corners=True."""
    n_out = 2 * n_in
    m = np.zeros((n_out, n_in), dtype=np.float32)
    if n_in == 1:
        m[:, 0] = 1.0
        return m
    scale = (n_in - 1) / (n_out - 1)
    for r in range(n_out):
        src = r * scale
        lo = min(int(np.floor(src)), n_in - 1)
        hi = min(lo + 1, n_in - 1)
        frac = src - lo
        m[r, lo] += 1.0 - frac
        m[r, hi] += frac
    return m


def _upsample_kron_T(h: int, w: int) -> jnp.ndarray:
    """(h*w, 4*h*w) bf16 matrix U^T so that  up_flat = x_flat @ U^T  is the exact
    bilinear 2x upsample (align_corners=True) as ONE lane-dense MXU matmul."""
    u = np.kron(_upsample_matrix(h), _upsample_matrix(w))      # (4hw, hw)
    return jnp.asarray(u.T, jnp.bfloat16)                      # (hw, 4hw)


def _fold_bn_flat(w, gamma, beta, mean, var, eps=1e-5):
    """Fold inference BatchNorm into the 3x3 conv and lay the weight out as a single
    wide-K slab (cout, 9*cin), K ordered (kh, kw)-major / cin-minor to match the
    in-kernel tap stack.  Returns (bf16 weight, f32 bias of shape (cout, 1))."""
    cout, cin = w.shape[0], w.shape[1]
    scale = gamma / jnp.sqrt(var + eps)
    wf = (w * scale[:, None, None, None]).astype(jnp.float32)        # (cout,cin,3,3)
    bias = (beta - mean * scale).astype(jnp.float32).reshape(cout, 1)
    wflat = jnp.transpose(wf, (0, 2, 3, 1)).reshape(cout, 9 * cin)   # (cout, 9*cin)
    return wflat.astype(jnp.bfloat16), bias


# ---------------------------------------------------------------------------
# pltpu.roll direction probe (robust to rotate-direction convention)
# ---------------------------------------------------------------------------

_ROLL_DIR = []


def _roll_direction() -> int:
    """+1 if pltpu.roll follows jnp.roll semantics (out[i] = x[i - shift]),
    -1 if it rotates the other way.  One tiny probe kernel, result cached."""
    if not _ROLL_DIR:
        def probe(x_ref, o_ref):
            o_ref[...] = pltpu.roll(x_ref[...], 1, axis=1)

        x = jnp.tile(jnp.arange(128, dtype=jnp.float32)[None, :], (8, 1))
        y = pl.pallas_call(
            probe, out_shape=jax.ShapeDtypeStruct((8, 128), jnp.float32))(x)
        _ROLL_DIR.append(1 if float(y[0, 0]) > 64.0 else -1)
    return _ROLL_DIR[0]


# ---------------------------------------------------------------------------
# in-kernel building blocks
# ---------------------------------------------------------------------------

def _make_taps9(H, W, roll_dir):
    """Returns taps9(x): (cin, H*W) f32 -> (9*cin, H*W) f32 stack of the 3x3 taps
    (padding=1).  Shifts are circular lane rotations (XLU slot, no hidden VMEM
    copies); out-of-image taps are zeroed once per tap with hoisted border masks."""
    HW = H * W
    pos = lax.broadcasted_iota(jnp.int32, (1, HW), 1)
    col = pos % W
    row_ok = {-1: pos >= W, 0: None, 1: pos < (HW - W)}
    col_ok = {-1: col != 0, 0: None, 1: col != (W - 1)}

    def taps9(x):
        outs = []
        for dh in (-1, 0, 1):
            for dw in (-1, 0, 1):
                s = dh * W + dw                          # tap reads x_flat[p + s]
                t = x if s == 0 else pltpu.roll(x, (-s * roll_dir) % HW, axis=1)
                rm, cm = row_ok[dh], col_ok[dw]
                mask = cm if rm is None else (rm if cm is None else (rm & cm))
                if mask is not None:
                    t = jnp.where(mask, t, 0.0)
                outs.append(t)
        return jnp.concatenate(outs, axis=0)             # (9*cin, HW)

    return taps9


def _conv3x3(xs, w_ref, b_ref, taps9):
    """3x3 conv (padding=1, BN folded) over the channel-concat of xs as ONE wide-K
    MXU matmul (cout, 9*cin) @ (9*cin, HW); bf16 operands, f32 accumulation."""
    xs = [x.astype(jnp.float32) for x in xs]
    x = xs[0] if len(xs) == 1 else jnp.concatenate(xs, axis=0)
    k = taps9(x).astype(jnp.bfloat16)
    return jnp.dot(w_ref[...], k, preferred_element_type=jnp.float32) + b_ref[...]


def _make_scale2_kernel(C, H2, W2, roll_dir):
    """Fused per-image kernel: upsample(x1) -> conv_upsample1 ; conv_1(x2) ;
    conv_concat2(cat(...)).  Output: cat_x2 flat (2C, H2*W2) in bf16."""
    def kernel(x1_ref, x2_ref, u1_ref,
               w_up1, b_up1, w_c1, b_c1, w_cat2, b_cat2, out_ref):
        taps9 = _make_taps9(H2, W2, roll_dir)
        up1 = jnp.dot(x1_ref[0], u1_ref[...], preferred_element_type=jnp.float32)
        up_x1 = _conv3x3([up1], w_up1, b_up1, taps9)
        conv_x2 = _conv3x3([x2_ref[0]], w_c1, b_c1, taps9)
        cat_x2 = _conv3x3([up_x1, conv_x2], w_cat2, b_cat2, taps9)
        out_ref[0] = cat_x2.astype(out_ref.dtype)
    return kernel


def _make_scale3_kernel(C, H3, W3, roll_dir):
    """Fused per-image kernel: upsample(x2)->conv_upsample2 ; conv_2(x3) ;
    conv_concat3 ; upsample(cat_x2)->conv_upsample3 ; conv_3 ; conv_concat4 ;
    conv5 (1x1 with bias).  Output: (out_ch, H3*W3) f32."""
    def kernel(x2_ref, x3_ref, cat2_ref, u2_ref,
               w_up2, b_up2, w_c2, b_c2, w_cat3, b_cat3,
               w_up3, b_up3, w_c3, b_c3, w_cat4, b_cat4,
               w5_ref, b5_ref, out_ref):
        taps9 = _make_taps9(H3, W3, roll_dir)

        up2 = jnp.dot(x2_ref[0], u2_ref[...], preferred_element_type=jnp.float32)
        up_x2 = _conv3x3([up2], w_up2, b_up2, taps9)
        conv_x3 = _conv3x3([x3_ref[0]], w_c2, b_c2, taps9)
        cat_x3 = _conv3x3([up_x2, conv_x3], w_cat3, b_cat3, taps9)

        up_cat = jnp.dot(cat2_ref[0], u2_ref[...], preferred_element_type=jnp.float32)
        up_cat_x2 = _conv3x3([up_cat], w_up3, b_up3, taps9)
        conv_cat_x3 = _conv3x3([cat_x3], w_c3, b_c3, taps9)
        cat_x4 = _conv3x3([up_cat_x2, conv_cat_x3], w_cat4, b_cat4, taps9)

        out = jnp.dot(w5_ref[...], cat_x4.astype(jnp.bfloat16),
                      preferred_element_type=jnp.float32) + b5_ref[...]
        out_ref[0] = out.astype(out_ref.dtype)
    return kernel


# ---------------------------------------------------------------------------
# full forward (2 pallas_calls)
# ---------------------------------------------------------------------------

def graph_node_s_forward(params, x1, x2, x3):
    """x1: (N,C,H,W), x2: (N,C,2H,2W), x3: (N,C,4H,4W) -> (N, out_channel, 4H, 4W)."""
    N, C, H1, W1 = x1.shape
    H2, W2 = 2 * H1, 2 * W1
    H3, W3 = 2 * H2, 2 * W2
    out_ch = params['conv5'][0].shape[0]
    rdir = _roll_direction()
    bf = jnp.bfloat16

    # lane-dense flat activations, bf16 on the wire (halved HBM/DMA bytes)
    f1 = x1.reshape(N, C, H1 * W1).astype(bf)
    f2 = x2.reshape(N, C, H2 * W2).astype(bf)
    f3 = x3.reshape(N, C, H3 * W3).astype(bf)

    u1 = _upsample_kron_T(H1, W1)                 # (H1W1, H2W2)
    u2 = _upsample_kron_T(H2, W2)                 # (H2W2, H3W3) (shared by both 2x ups)

    w_up1, b_up1 = _fold_bn_flat(*params['conv_upsample1'])
    w_c1, b_c1 = _fold_bn_flat(*params['conv_1'])
    w_cat2, b_cat2 = _fold_bn_flat(*params['conv_concat2'])
    w_up2, b_up2 = _fold_bn_flat(*params['conv_upsample2'])
    w_c2, b_c2 = _fold_bn_flat(*params['conv_2'])
    w_cat3, b_cat3 = _fold_bn_flat(*params['conv_concat3'])
    w_up3, b_up3 = _fold_bn_flat(*params['conv_upsample3'])
    w_c3, b_c3 = _fold_bn_flat(*params['conv_3'])
    w_cat4, b_cat4 = _fold_bn_flat(*params['conv_concat4'])
    w5, b5 = params['conv5']
    w5 = w5.reshape(out_ch, 4 * C).astype(bf)
    b5 = b5.reshape(out_ch, 1).astype(jnp.float32)

    cparams = pltpu.CompilerParams(
        dimension_semantics=("parallel",),
        vmem_limit_bytes=32 * 1024 * 1024)

    def act_spec(c, hw):
        return pl.BlockSpec((1, c, hw), lambda n: (n, 0, 0))

    def mat_spec(r, c):
        return pl.BlockSpec((r, c), lambda n: (0, 0))

    # --- scale 2: upsample + conv_upsample1 + conv_1 + conv_concat2 (one kernel) ---
    cat2 = pl.pallas_call(
        _make_scale2_kernel(C, H2, W2, rdir),
        out_shape=jax.ShapeDtypeStruct((N, 2 * C, H2 * W2), bf),
        grid=(N,),
        in_specs=[act_spec(C, H1 * W1), act_spec(C, H2 * W2),
                  mat_spec(H1 * W1, H2 * W2),
                  mat_spec(C, 9 * C), mat_spec(C, 1),
                  mat_spec(C, 9 * C), mat_spec(C, 1),
                  mat_spec(2 * C, 18 * C), mat_spec(2 * C, 1)],
        out_specs=act_spec(2 * C, H2 * W2),
        compiler_params=cparams,
    )(f1, f2, u1, w_up1, b_up1, w_c1, b_c1, w_cat2, b_cat2)

    # --- scale 3: everything else, including the 1x1 conv5 head (one kernel) ---
    out = pl.pallas_call(
        _make_scale3_kernel(C, H3, W3, rdir),
        out_shape=jax.ShapeDtypeStruct((N, out_ch, H3 * W3), jnp.float32),
        grid=(N,),
        in_specs=[act_spec(C, H2 * W2), act_spec(C, H3 * W3),
                  act_spec(2 * C, H2 * W2),
                  mat_spec(H2 * W2, H3 * W3),
                  mat_spec(C, 9 * C), mat_spec(C, 1),
                  mat_spec(C, 9 * C), mat_spec(C, 1),
                  mat_spec(2 * C, 18 * C), mat_spec(2 * C, 1),
                  mat_spec(2 * C, 18 * C), mat_spec(2 * C, 1),
                  mat_spec(2 * C, 18 * C), mat_spec(2 * C, 1),
                  mat_spec(4 * C, 36 * C), mat_spec(4 * C, 1),
                  mat_spec(out_ch, 4 * C), mat_spec(out_ch, 1)],
        out_specs=act_spec(out_ch, H3 * W3),
        compiler_params=cparams,
    )(f2, f3, cat2, u2,
      w_up2, b_up2, w_c2, b_c2, w_cat3, b_cat3,
      w_up3, b_up3, w_c3, b_c3, w_cat4, b_cat4, w5, b5)

    return out.reshape(N, out_ch, H3, W3)


# ---------------------------------------------------------------------------
# parameters + pure-JAX reference (for self-check)
# ---------------------------------------------------------------------------

def init_params(key, channel, out_channel):
    def bconv(k, cin, cout):
        k1, k2, k3, k4, k5 = jax.random.split(k, 5)
        w = 0.1 * jax.random.normal(k1, (cout, cin, 3, 3), jnp.float32)
        gamma = 1.0 + 0.1 * jax.random.normal(k2, (cout,), jnp.float32)
        beta = 0.1 * jax.random.normal(k3, (cout,), jnp.float32)
        mean = 0.1 * jax.random.normal(k4, (cout,), jnp.float32)
        var = 0.5 + jnp.abs(jax.random.normal(k5, (cout,), jnp.float32))
        return (w, gamma, beta, mean, var)

    ks = jax.random.split(key, 11)
    C = channel
    return {
        'conv_upsample1': bconv(ks[0], C, C),
        'conv_upsample2': bconv(ks[1], C, C),
        'conv_upsample3': bconv(ks[2], 2 * C, 2 * C),
        'conv_1': bconv(ks[3], C, C),
        'conv_2': bconv(ks[4], C, C),
        'conv_3': bconv(ks[5], 2 * C, 2 * C),
        'conv_concat2': bconv(ks[6], 2 * C, 2 * C),
        'conv_concat3': bconv(ks[7], 2 * C, 2 * C),
        'conv_concat4': bconv(ks[8], 4 * C, 4 * C),
        'conv5': (0.1 * jax.random.normal(ks[9], (out_channel, 4 * C, 1, 1), jnp.float32),
                  0.1 * jax.random.normal(ks[10], (out_channel,), jnp.float32)),
    }


def _ref_upsample(x):
    N, C, H, W = x.shape
    H2, W2 = 2 * H, 2 * W
    r = jnp.arange(H2, dtype=jnp.float32) * (H - 1) / (H2 - 1)
    c = jnp.arange(W2, dtype=jnp.float32) * (W - 1) / (W2 - 1)
    r0 = jnp.floor(r).astype(jnp.int32)
    c0 = jnp.floor(c).astype(jnp.int32)
    r1 = jnp.minimum(r0 + 1, H - 1)
    c1 = jnp.minimum(c0 + 1, W - 1)
    fr = (r - r0.astype(jnp.float32))[:, None]
    fc = (c - c0.astype(jnp.float32))[None, :]

    def gather(ri, ci_):
        return x[:, :, ri, :][:, :, :, ci_]

    top = gather(r0, c0) * (1.0 - fc) + gather(r0, c1) * fc
    bot = gather(r1, c0) * (1.0 - fc) + gather(r1, c1) * fc
    return top * (1.0 - fr) + bot * fr


def _ref_basic_conv(x, w, gamma, beta, mean, var, eps=1e-5):
    y = lax.conv_general_dilated(
        x, w, window_strides=(1, 1), padding=((1, 1), (1, 1)),
        dimension_numbers=('NCHW', 'OIHW', 'NCHW'),
        precision=lax.Precision.HIGHEST)
    scale = gamma / jnp.sqrt(var + eps)
    return y * scale[None, :, None, None] + (beta - mean * scale)[None, :, None, None]


def _reference_forward(params, x1, x2, x3):
    bc = lambda name, x: _ref_basic_conv(x, *params[name])
    up_x1 = bc('conv_upsample1', _ref_upsample(x1))
    conv_x2 = bc('conv_1', x2)
    cat_x2 = bc('conv_concat2', jnp.concatenate([up_x1, conv_x2], axis=1))
    up_x2 = bc('conv_upsample2', _ref_upsample(x2))
    conv_x3 = bc('conv_2', x3)
    cat_x3 = bc('conv_concat3', jnp.concatenate([up_x2, conv_x3], axis=1))
    up_cat_x2 = bc('conv_upsample3', _ref_upsample(cat_x2))
    conv_cat_x3 = bc('conv_3', cat_x3)
    cat_x4 = bc('conv_concat4', jnp.concatenate([up_cat_x2, conv_cat_x3], axis=1))
    w5, b5 = params['conv5']
    out = lax.conv_general_dilated(
        cat_x4, w5, window_strides=(1, 1), padding=((0, 0), (0, 0)),
        dimension_numbers=('NCHW', 'OIHW', 'NCHW'),
        precision=lax.Precision.HIGHEST)
    return out + b5[None, :, None, None]


if __name__ == "__main__":
    key = jax.random.PRNGKey(0)
    kx1, kx2, kx3, kp = jax.random.split(key, 4)

    N, C, OUT_C, H = 2, 4, 8, 8          # x1: 8x8, x2: 16x16, x3: 32x32
    x1 = jax.random.normal(kx1, (N, C, H, H), jnp.float32)
    x2 = jax.random.normal(kx2, (N, C, 2 * H, 2 * H), jnp.float32)
    x3 = jax.random.normal(kx3, (N, C, 4 * H, 4 * H), jnp.float32)
    params = init_params(kp, C, OUT_C)

    _roll_direction()                    # prime the roll-direction probe outside jit

    fwd = jax.jit(graph_node_s_forward)
    out = fwd(params, x1, x2, x3)
    jax.block_until_ready(out)
    assert out.shape == (N, OUT_C, 4 * H, 4 * H), out.shape

    ref = _reference_forward(params, x1, x2, x3)
    rel_err = float(jnp.max(jnp.abs(out - ref)) / (jnp.max(jnp.abs(ref)) + 1e-6))
    assert rel_err < 5e-2, f"mismatch vs pure-JAX reference (rel err {rel_err})"

    print("KERNEL_OK")
</pallas_src>

<mosaic_0001>
module attributes {stable_mosaic.version = 11 : i64} {
  func.func @probe(%arg0: memref<8x128xf32, #tpu.memory_space<vmem>>, %arg1: memref<8x128xf32, #tpu.memory_space<vmem>>) attributes {dimension_semantics = [], scalar_prefetch = 0 : i64, scratch_operands = 0 : i64, tpu.core_type = #tpu.core_type<tc>} {
    %c0 = arith.constant 0 : index
    %c0_0 = arith.constant 0 : index
    %0 = vector.load %arg0[%c0, %c0_0] : memref<8x128xf32, #tpu.memory_space<vmem>>, vector<8x128xf32>
    %c1_i32 = arith.constant 1 : i32
    %1 = tpu.dynamic_rotate %0 by %c1_i32 dim 1 : vector<8x128xf32>, i32 -> vector<8x128xf32>
    %c0_1 = arith.constant 0 : index
    %c0_2 = arith.constant 0 : index
    %2 = vector.load %arg1[%c0_1, %c0_2] : memref<8x128xf32, #tpu.memory_space<vmem>>, vector<8x128xf32>
    tpu.vector_store %arg1[%c0_1, %c0_2], %1 {strides = array<i32>} : memref<8x128xf32, #tpu.memory_space<vmem>>, vector<8x128xf32>,
    return
  }
}

</mosaic_0001>

<bundles_post_ra>
// kernel: tpu_custom_call.1
= control target key start
LH: loop header
LB: loop body
LE: loop exit
PB: predicated region body
PF: predicated region fallthrough
CT: control target
= control target key end

     0   :  { %6 = vsyncpa [#allocation3], 0  ;;  %s118_s0 = inlined_call_operand.hbm [shape: f32[8,128], index: 0, kind: input, shape index: {}]   ;;  %s119_s1 = inlined_call_operand.hbm [shape: f32[8,128], index: 1, kind: output, shape index: {}]  }
   0x1   :  { %7 = vsyncpa [#allocation4], 0  ;;  %s13_s8 = sshll.u32 %s118_s0, 4  ;;  %s99_s9 = smov [#allocation2]   ;;  %s14_s8 = int_to_ptr.hbm [resolvable:$true] %s13_s8 }
   0x2   :  { %s15_s10 = sshll.u32 %s99_s9, 4  ;;  %s16_s10 = int_to_ptr.vmem [resolvable:$true] %s15_s10 }
   0x3   :  { %18 = dma.hbm_to_vmem [thread:$0]  %s14_s8, 128, %s16_s10, [#allocation3]  }
   0x4   :  { %95 = dma.done.wait [#allocation3], 128  }
   0x5   :  { %96 = vsyncadd [#allocation3], 4294967168  ;;  %v23_v0 = vld [vmem:[#allocation2] sm:$0xff]  ;;  %s100_s11 = smov 1   ;;  %s101_s12 = smov [#allocation5]  }
   0x6   :  { %24 = vrot.lane.b32.xlu0 %v23_v0, %s100_s11  ;;  %s32_s13 = sshll.u32 %s101_s12, 4  ;;  %s34_s16 = sshll.u32 %s119_s1, 4  ;;  %s33_s13 = int_to_ptr.vmem [resolvable:$true] %s32_s13  ;;  %s35_s16 = int_to_ptr.hbm [resolvable:$true] %s34_s16 }
  0x78   :  { %v25_v1 = vpop.permute.xlu0 %24 }
  0x79   :  { %26 = vst [vmem:[#allocation5] sm:$0xff] %v25_v1 }
  0x7a   :  { %37 = dma.vmem_to_hbm [thread:$0]  %s33_s13, 128, %s35_s16, [#allocation4]  }
  0x7b   :  { %97 = dma.done.wait [#allocation4], 128  }
  0x7c   :  { %98 = vsyncadd [#allocation4], 4294967168 }
  0x7d   :  { %42 = vsyncpa [#allocation3], 1 }
  0x7e   :  { %43 = vsyncpa [#allocation4], 1 }

</bundles_post_ra>
